<compile_context>
chip_gen: v7x
topology: tpu7x:2x2x1
jax: 0.10.0
libtpu: 0.0.40
codegen_flags: <defaults>
</compile_context>

<pallas_src>
from functools import partial

import jax
import jax.numpy as jnp
from jax import lax
from jax.experimental import pallas as pl
from jax.experimental.pallas import tpu as pltpu


# --------------------------------------------------------------------------- #
# Helpers
# --------------------------------------------------------------------------- #
def _prod(xs):
    out = 1
    for v in xs:
        out *= int(v)
    return out


def _round_up(v, m):
    return ((v + m - 1) // m) * m


def _sublane(itemsize):
    # Sublane packing granularity: 8 rows of 32-bit -> 8 (f32) / 16 (bf16) / 32 (i8).
    return 8 * max(1, 4 // max(1, itemsize))


def _padded_block_bytes(block, itemsize):
    dims = list(block)
    if len(dims) >= 1:
        dims[-1] = _round_up(dims[-1], 128)
    if len(dims) >= 2:
        dims[-2] = _round_up(dims[-2], _sublane(itemsize))
    return _prod(dims) * itemsize


def _vmem_limit_bytes(blocks, itemsize):
    # in + out, double-buffered, with slack; clamped to a value valid on every
    # generation (v5e/v6e: 128 MiB physical VMEM, v7x: 64 MiB physical).
    needed = 2 * sum(_padded_block_bytes(b, itemsize) for b in blocks)
    return int(min(32 << 20, max(16 << 20, 2 * needed)))


def _pick_swap_tiles(A, B, row_bytes, itemsize, target_bytes, max_bytes):
    """Tiles (ta, tb) of the two swapped axes for the non-minor-swap fast path.

    Each tile must be either the full extent or a multiple of the sublane
    packing granularity, because the tiled axis ends up as the second-to-last
    dim of one of the two blocks ((8, 128)-rule).  We prefer keeping the inner
    swapped axis B whole (contiguous output writeback) and sizing ta so each
    block carries ~target_bytes of HBM traffic.
    """
    sub = _sublane(itemsize)

    if B <= sub or row_bytes * B <= max_bytes:
        tb = B
    else:
        tb = max(sub, (max(1, target_bytes // row_bytes) // sub) * sub)
        tb = min(tb, B)                      # clamp hits -> tb == B (full, legal)

    slab = row_bytes * tb
    if A <= sub or slab * A <= max_bytes:
        ta = A
    else:
        ideal = max(1, target_bytes // slab)
        ta = (ideal // sub) * sub if ideal >= sub else sub
        ta = min(max(ta, sub), A)            # clamp hits -> ta == A (full, legal)
    return ta, tb


# --------------------------------------------------------------------------- #
# Kernels
# --------------------------------------------------------------------------- #
def _swap_copy_kernel(x_ref, o_ref):
    """Non-minor swap.  x block: (P, TA, Q, TB, R); o block: (P, TB, Q, TA, R).

    The HBM <-> VMEM movement is a dense rectangular DMA per grid step; the
    TA <-> TB axis swap happens here as (P, TB, R)-slab VMEM copies (the
    trailing chunk R is untouched, so this is plain vld/vst, no XLU work).
    """
    ta = x_ref.shape[1]
    q = x_ref.shape[2]

    def copy_one_a(a, carry):
        for qi in range(q):                  # static; q is a block dim (usually 1)
            o_ref[:, :, qi, a, :] = x_ref[:, a, qi, :, :]
        return carry

    lax.fori_loop(0, ta, copy_one_a, 0)


def _minor_swap_kernel(x_ref, o_ref):
    """Minor-axis swap.  x block: (1, tA, Q, tB); o block: (1, tB, Q, tA).

    Genuine lane relayout: a 2-D transpose (XLU) per (p, q) slice of the tile.
    """
    q = x_ref.shape[2]
    for qi in range(q):                      # static
        o_ref[0, :, qi, :] = jnp.transpose(x_ref[0, :, qi, :], (1, 0))


# --------------------------------------------------------------------------- #
# Wrapper
# --------------------------------------------------------------------------- #
def pallas_transpose(x, dim1=0, dim2=1, *,
                     target_block_bytes=1 << 20,
                     max_block_bytes=4 << 20):
    """Pallas equivalent of torch.Tensor.transpose(dim1, dim2)."""
    ndim = x.ndim
    if ndim == 0:
        return x
    d1 = dim1 % ndim
    d2 = dim2 % ndim
    if d1 == d2:
        return x
    if d1 > d2:
        d1, d2 = d2, d1

    perm = list(range(ndim))
    perm[d1], perm[d2] = perm[d2], perm[d1]
    perm = tuple(perm)
    out_shape = tuple(x.shape[p] for p in perm)

    if x.size == 0:
        # Zero-sized dims: pure metadata op, nothing for a kernel to do.
        return jnp.transpose(x, perm)

    itemsize = x.dtype.itemsize
    nbytes = int(x.size) * itemsize
    cost = pl.CostEstimate(flops=0, transcendentals=0, bytes_accessed=2 * nbytes)

    shape = x.shape
    P = _prod(shape[:d1])                    # axes before d1 (unchanged)
    A = int(shape[d1])                       # outer swapped axis
    Q = _prod(shape[d1 + 1:d2])              # axes between d1 and d2 (unchanged)
    B = int(shape[d2])                       # inner swapped axis

    if d2 < ndim - 1:
        # ------------- Fast path: neither swapped axis is the minor axis ----
        R = _prod(shape[d2 + 1:])            # contiguous trailing chunk (incl. lane dim)
        row_bytes = P * Q * R * itemsize     # bytes per (a, b) pair
        ta, tb = _pick_swap_tiles(A, B, row_bytes, itemsize,
                                  target_block_bytes, max_block_bytes)

        x5 = x.reshape(P, A, Q, B, R)        # contiguous merge: free
        out5_shape = (P, B, Q, A, R)
        in_block = (P, ta, Q, tb, R)
        out_block = (P, tb, Q, ta, R)
        # Innermost grid axis advances A, the output's more-minor swapped axis,
        # so consecutive output writebacks are at the smaller stride.
        grid = (pl.cdiv(B, tb), pl.cdiv(A, ta))
        # NOTE: P/Q/R stay whole inside the block; for pathological shapes
        # where a single (a, b) slab exceeds the budget the block simply grows
        # (vmem_limit below is sized to match, capped at 32 MiB).
        vmem_limit = _vmem_limit_bytes((in_block, out_block), itemsize)

        y5 = pl.pallas_call(
            _swap_copy_kernel,
            out_shape=jax.ShapeDtypeStruct(out5_shape, x.dtype),
            grid=grid,
            in_specs=[pl.BlockSpec(in_block, lambda j, i: (0, i, 0, j, 0))],
            out_specs=pl.BlockSpec(out_block, lambda j, i: (0, j, 0, i, 0)),
            compiler_params=pltpu.CompilerParams(
                dimension_semantics=("parallel", "parallel"),
                vmem_limit_bytes=vmem_limit,
            ),
            cost_estimate=cost,
        )(x5)
        return y5.reshape(out_shape)         # contiguous split: free

    # ----------------- Minor-axis swap: tiled 2-D transpose ----------------
    # View x as (P, A, Q, B) with B the lane axis; output is (P, B, Q, A).
    x4 = x.reshape(P, A, Q, B)
    out4_shape = (P, B, Q, A)
    # Tile sizes must be the full extent or a multiple of 128 (each tiled axis
    # becomes the minor dim of one of the two blocks).
    ta = A if A <= 256 else 256
    tb = B if B <= 256 else 256
    in_block = (1, ta, Q, tb)
    out_block = (1, tb, Q, ta)
    grid = (P, pl.cdiv(B, tb), pl.cdiv(A, ta))   # innermost axis advances A
    vmem_limit = _vmem_limit_bytes((in_block, out_block), itemsize)

    y4 = pl.pallas_call(
        _minor_swap_kernel,
        out_shape=jax.ShapeDtypeStruct(out4_shape, x.dtype),
        grid=grid,
        in_specs=[pl.BlockSpec(in_block, lambda p, j, i: (p, i, 0, j))],
        out_specs=pl.BlockSpec(out_block, lambda p, j, i: (p, j, 0, i)),
        compiler_params=pltpu.CompilerParams(
            dimension_semantics=("parallel", "parallel", "parallel"),
            vmem_limit_bytes=vmem_limit,
        ),
        cost_estimate=cost,
    )(x4)
    return y4.reshape(out_shape)


class TransposePallas:
    """Mirror of the PyTorch `Transpose` nn.Module (no parameters)."""

    def __init__(self, dim1=0, dim2=1):
        self.dim1 = dim1
        self.dim2 = dim2

    def __call__(self, x):
        return pallas_transpose(x, self.dim1, self.dim2)


# --------------------------------------------------------------------------- #
# Self-test
# --------------------------------------------------------------------------- #
if __name__ == "__main__":
    def check(x, d1, d2, **kw):
        y = jax.block_until_ready(pallas_transpose(x, d1, d2, **kw))
        ref = jnp.swapaxes(x, d1, d2)
        assert y.shape == ref.shape, (y.shape, ref.shape)
        assert y.dtype == ref.dtype, (y.dtype, ref.dtype)
        assert bool(jnp.array_equal(y, ref)), (
            f"Pallas transpose mismatch: shape={x.shape} dims=({d1},{d2})")

    key = jax.random.PRNGKey(0)
    k1, k2, k3, k4, k5, k6 = jax.random.split(key, 6)

    # 1) The module's default use: batch=2, seq=8, hidden=32, dims (0, 1).
    x = jax.random.normal(k1, (2, 8, 32), dtype=jnp.float32)
    check(x, 0, 1)
    y = jax.block_until_ready(TransposePallas()(x))          # module-style call
    assert bool(jnp.array_equal(y, jnp.swapaxes(x, 0, 1)))
    check(x.astype(jnp.bfloat16), 0, 1)                       # bf16 copy path

    # 2) 4-D input, swap of two non-minor axes.
    check(jax.random.normal(k2, (2, 4, 8, 32), jnp.float32), 1, 2)

    # 3) Swap involving the minor axis with a middle axis (tiled 2-D transpose).
    check(jax.random.normal(k3, (4, 3, 32), jnp.float32), 0, 2)

    # 4) Plain 2-D transpose (minor path, Q == 1).
    check(jax.random.normal(k4, (8, 32), jnp.float32), 0, 1)

    # 5) Force a multi-step grid + tiled inner swapped axis (exercises the
    #    in-kernel slab-copy loop over several blocks).
    check(jax.random.normal(k5, (16, 24, 32), jnp.float32), 0, 1,
          target_block_bytes=512, max_block_bytes=1024)

    # 6) Uneven tiling along the outer swapped axis (partial edge block).
    check(jax.random.normal(k6, (10, 8, 32), jnp.float32), 0, 1,
          target_block_bytes=256, max_block_bytes=512)

    print("KERNEL_OK")
</pallas_src>

<mosaic_0001>
module attributes {stable_mosaic.version = 11 : i64} {
  func.func @_swap_copy_kernel(%arg0: i32, %arg1: i32, %arg2: memref<1x2x1x8x32xf32, #tpu.memory_space<vmem>>, %arg3: memref<1x8x1x2x32xf32, #tpu.memory_space<vmem>>) attributes {dimension_semantics = [#tpu.dimension_semantics<parallel>, #tpu.dimension_semantics<parallel>], iteration_bounds = array<i64: 1, 1>, scalar_prefetch = 0 : i64, scratch_operands = 0 : i64, tpu.core_type = #tpu.core_type<tc>, window_params = [{transform_indices = @transform_0, window_bounds = array<i64: 1, 2, 1, 8, 32>}, {transform_indices = @transform_1, window_bounds = array<i64: 1, 8, 1, 2, 32>}]} {
    %c0_i32 = arith.constant 0 : i32
    %c2_i32 = arith.constant 2 : i32
    %0 = arith.addi %c0_i32, %c2_i32 : i32
    %c1_i32 = arith.constant 1 : i32
    scf.for %arg4 = %c0_i32 to %0 step %c1_i32  : i32 {
      %c0 = arith.constant 0 : index
      %1 = arith.index_cast %arg4 : i32 to index
      %c0_1 = arith.constant 0 : index
      %c0_2 = arith.constant 0 : index
      %c0_3 = arith.constant 0 : index
      %2 = vector.load %arg2[%c0, %1, %c0_1, %c0_2, %c0_3] : memref<1x2x1x8x32xf32, #tpu.memory_space<vmem>>, vector<1x1x1x8x32xf32>
      %3 = vector.shape_cast %2 : vector<1x1x1x8x32xf32> to vector<1x8x32xf32>
      %c0_4 = arith.constant 0 : index
      %c0_5 = arith.constant 0 : index
      %c0_6 = arith.constant 0 : index
      %4 = arith.index_cast %arg4 : i32 to index
      %c0_7 = arith.constant 0 : index
      %5 = vector.load %arg3[%c0_4, %c0_5, %c0_6, %4, %c0_7] : memref<1x8x1x2x32xf32, #tpu.memory_space<vmem>>, vector<1x8x1x1x32xf32>
      %6 = vector.shape_cast %5 : vector<1x8x1x1x32xf32> to vector<1x8x32xf32>
      %7 = vector.shape_cast %3 : vector<1x8x32xf32> to vector<1x8x1x1x32xf32>
      tpu.vector_store %arg3[%c0_4, %c0_5, %c0_6, %4, %c0_7], %7 {strides = array<i32>} : memref<1x8x1x2x32xf32, #tpu.memory_space<vmem>>, vector<1x8x1x1x32xf32>,
    }
    %c2_i32_0 = arith.constant 2 : i32
    return
  }
  func.func @transform_0(%arg0: i32, %arg1: i32) -> (i32, i32, i32, i32, i32) {
    %c0_i32 = arith.constant 0 : i32
    %c0_i32_0 = arith.constant 0 : i32
    %c0_i32_1 = arith.constant 0 : i32
    %c0_i32_2 = arith.constant 0 : i32
    return %c0_i32, %arg1, %c0_i32_0, %arg0, %c0_i32_1 : i32, i32, i32, i32, i32
  }
  func.func @transform_1(%arg0: i32, %arg1: i32) -> (i32, i32, i32, i32, i32) {
    %c0_i32 = arith.constant 0 : i32
    %c0_i32_0 = arith.constant 0 : i32
    %c0_i32_1 = arith.constant 0 : i32
    %c0_i32_2 = arith.constant 0 : i32
    return %c0_i32, %arg0, %c0_i32_0, %arg1, %c0_i32_1 : i32, i32, i32, i32, i32
  }
}

</mosaic_0001>

<bundles_post_ra>
// kernel: tpu_custom_call.1
= control target key start
LH: loop header
LB: loop body
LE: loop exit
PB: predicated region body
PF: predicated region fallthrough
CT: control target
= control target key end

     0   :  { %6 = vsyncpa [#allocation3], 0  ;;  %s256_s0 = inlined_call_operand.hbm [shape: f32[1,2,1,8,32], index: 0, kind: input, shape index: {}]   ;;  %s257_s1 = inlined_call_operand.hbm [shape: f32[1,8,1,2,32], index: 1, kind: output, shape index: {}]  }
   0x1   :  { %7 = vsyncpa [#allocation4], 0  ;;  %s197_s6 = smov [#allocation2]   ;;  %s141_s10 = scalar_lea.hbm %s256_s0, 256 }
   0x2   :  { %s13_s7 = sshll.u32 %s197_s6, 4  ;;  %p142_p0 = scmp.ne.s32.totalorder %s256_s0, %s141_s10  ;;  %s14_s7 = int_to_ptr.vmem [resolvable:$true] %s13_s7 }
   0x3   :  { %p145_p1 = scmp.lt.u32.totalorder %s141_s10, %s256_s0 }
   0x5   :  { %p147_p2 = pnand %p145_p1, %p142_p0 }
   0x7   :  { %150 = shalt.err (!%p147_p2)
}
   0x8   :  { %s151_s15 = scalar_lea.vmem %s14_s7, 256  ;;  %p156_p4 = scmp.lt.s32.totalorder %s14_s7, %s14_s7 }
   0x9   :  { %p152_p3 = scmp.ne.s32.totalorder %s14_s7, %s151_s15  ;;  %p157_p5 = scmp.lt.s32.totalorder %s151_s15, %s151_s15 }
   0xb   :  { %p158_p6 = por %p157_p5, %p156_p4 }
   0xd   :  { %p159_p7 = pnand %p158_p6, %p152_p3 }
   0xf   :  { %162 = shalt.err (!%p159_p7)
}
  0x10   :  { %s198_s16 = smov 128   ;;  %s199_s17 = smov 8  }
  0x11   :  { %19 = dma.hbm_to_vmem [thread:$0]  %s256_s0, 256, %s14_s7, [#allocation3], %s198_s16, %s198_s16, %s199_s17  }
  0x12   :  { %189 = dma.done.wait [#allocation3], 256  }
  0x13   :  { %190 = vsyncadd [#allocation3], 4294967040  ;;  %s226_s20 = smov 0  }
  0x14 LB: > { %v37_v0 = vlaneseq  ;;  %v200_v1 = vmov 1966171168   ;;  %s125_s21 = sshll.u32 %s195_s20, 3  ;;  %vm91_vm0 = vcmask 253952   ;;  %s90_s0 = scalar_lea.vmem [#allocation5], %s195_s20  ;;  %s195_s20 = sphi %s226_s20, %s28_s20  }
  0x15   : > { %v35_v2 = vunpack.c.l.s4 %v200_v1  ;;  %s30_s22 = scalar_lea.vmem [#allocation2], %s125_s21  ;;  %s28_s20 = sadd.s32 1, %s195_s20  }
  0x16   : > { %v38_v3 = vshrl.u32 %v37_v0, 7  ;;  %v31_v5 = vld [vmem:[%s30_s22] sm:$0xff]  ;;  %p25_p8 = scmp.ge.s32.totalorder %s28_s20, 2  }
  0x17   : > { %v36_v4 = vunpack.c.0.s8 %v35_v2  ;;  %v33_v7 = vcombine.high %v31_v5, %v31_v5  ;;  %s201_s23 = smov (%p25_p8), [#allocation5]  }
  0x18   :  { %s105_s24 = sshll.u32 (%p25_p8), %s201_s23, 4  ;;  %s106_s24 = int_to_ptr.vmem [resolvable:$true] %s105_s24 }
  0x19   : > { %v39_v6 = vsub.s32 %v36_v4, %v38_v3  ;;  %s163_s25 = scalar_lea.vmem (%p25_p8), %s106_s24, 256  ;;  %p168_p10 = scmp.lt.s32.totalorder (%p25_p8), %s106_s24, %s106_s24 }
  0x1a   :  { %p164_p9 = scmp.ne.s32.totalorder (%p25_p8), %s106_s24, %s163_s25  ;;  %p169_p11 = scmp.lt.s32.totalorder (%p25_p8), %s163_s25, %s163_s25 }
  0x1b   : > { %v40_v8 = vrot.slane %v31_v5, %v39_v6  ;;  %v47_v9 = vrot.slane %v33_v7, %v39_v6 }
  0x1c   :  { %p170_p12 = por (%p25_p8), %p169_p11, %p168_p10 }
  0x1d   : > { %v56_v10 = vrot.slane %v40_v8, %v39_v6  ;;  %v48_v11 = vcombine.high %v40_v8, %v40_v8  ;;  %v63_v12 = vrot.slane %v47_v9, %v39_v6  ;;  %v49_v13 = vcombine.high %v47_v9, %v47_v9  ;;  %27 = sbr.rel (!%p25_p8) target bundleno = 20 (0x14), region = 37 }
  0x1e   :  { %p171_p13 = pnand (%p25_p8), %p170_p12, %p164_p9 }
  0x1f   : > { %92 = vst.msk [vmem:[%s90_s0] sm:$0x1] %vm91_vm0, %v56_v10  ;;  %v70_v14 = vrot.slane %v48_v11, %v39_v6  ;;  %v78_v15 = vcombine.high %v56_v10, %v56_v10  ;;  %96 = vst.msk [vmem:[%s90_s0 + $0x8] sm:$0x1] %vm91_vm0, %v63_v12  ;;  %v77_v16 = vrot.slane %v49_v13, %v39_v6 }
  0x20   : > { %v79_v17 = vcombine.high %v63_v12, %v63_v12 }
  0x21   : > { %93 = vst.msk [vmem:[%s90_s0 + $0x2] sm:$0x1] %vm91_vm0, %v70_v14  ;;  %94 = vst.msk [vmem:[%s90_s0 + $0x4] sm:$0x1] %vm91_vm0, %v78_v15  ;;  %v80_v18 = vcombine.high %v70_v14, %v70_v14  ;;  %v81_v19 = vcombine.high %v77_v16, %v77_v16 }
  0x22   : > { %97 = vst.msk [vmem:[%s90_s0 + $0xa] sm:$0x1] %vm91_vm0, %v77_v16  ;;  %98 = vst.msk [vmem:[%s90_s0 + $0xc] sm:$0x1] %vm91_vm0, %v79_v17 }
  0x23   : > { %95 = vst.msk [vmem:[%s90_s0 + $0x6] sm:$0x1] %vm91_vm0, %v80_v18  ;;  %99 = vst.msk [vmem:[%s90_s0 + $0xe] sm:$0x1] %vm91_vm0, %v81_v19 }
  0x24   :  { %174 = shalt.err (!%p171_p13)
}
  0x25   :  { %s175_s28 = scalar_lea.hbm %s257_s1, 256 }
  0x26   :  { %p176_p0 = scmp.ne.s32.totalorder %s257_s1, %s175_s28  ;;  %p179_p1 = scmp.lt.u32.totalorder %s175_s28, %s257_s1 }
  0x28   :  { %p181_p2 = pnand %p179_p1, %p176_p0 }
  0x2a   :  { %184 = shalt.err (!%p181_p2)
}
  0x2b   :  { %s202_s4 = smov 32   ;;  %s203_s5 = smov 2  }
  0x2c   :  { %111 = dma.vmem_to_hbm [thread:$0]  %s106_s24, 256, %s257_s1, [#allocation4], %s202_s4, %s202_s4, %s203_s5  }
  0x2d   :  { %191 = dma.done.wait [#allocation4], 256  }
  0x2e   :  { %192 = vsyncadd [#allocation4], 4294967040 }
  0x2f   :  { %115 = vsyncpa [#allocation3], 1 }
  0x30   :  { %116 = vsyncpa [#allocation4], 1 }

</bundles_post_ra>
